<compile_context>
chip_gen: v6e
topology: v6e:2x2x1
jax: 0.10.0
libtpu: 0.0.40
codegen_flags: <defaults>
</compile_context>

<pallas_src>
import functools

import jax
import jax.numpy as jnp
from jax.experimental import pallas as pl
from jax.experimental.pallas import tpu as pltpu

_LN_EPS = 1e-5  # torch.nn.LayerNorm default


# ------------------------------ fused kernel -------------------------------- #
def _nn2_fused_kernel(x_ref, w_in_ref, b_in_ref,
                      w1_ref, b1_ref, w2_ref, b2_ref,
                      w_out_ref, b_out_ref, o_ref, *, n_layers, inv_h):
    x = x_ref[...]

    def layer_norm(v):
        # One-pass statistics: two independent XLU reductions.
        s = jnp.sum(v, axis=-1, keepdims=True)
        ss = jnp.sum(v * v, axis=-1, keepdims=True)
        mu = s * inv_h
        var = ss * inv_h - mu * mu
        # Affine (gamma, beta) is pre-folded into the next matmul's weights.
        return (v - mu) * jax.lax.rsqrt(var + _LN_EPS)

    # Input linear.
    h = jnp.dot(x, w_in_ref[...], preferred_element_type=jnp.float32) + b_in_ref[...]

    # Residual blocks (static unrolled loop; n_layers is a Python int).
    for l in range(n_layers):
        identity = h
        o = layer_norm(h)
        o = jnp.tanh(
            jnp.dot(o, w1_ref[l], preferred_element_type=jnp.float32) + b1_ref[l])
        o = layer_norm(o)
        o = (jnp.dot(o, w2_ref[l], preferred_element_type=jnp.float32)
             + b2_ref[l] + identity)
        h = jnp.tanh(o)

    # Output linear (padded lane-dense slab for small batches, compact for large).
    o_ref[...] = (jnp.dot(h, w_out_ref[...], preferred_element_type=jnp.float32)
                  + b_out_ref[...])


# ------------------------------ wrapper ------------------------------------- #
def _const_spec(a):
    nd = a.ndim
    # Whole array, same block every grid step -> stays VMEM-resident.
    return pl.BlockSpec(a.shape, lambda i, _nd=nd: (0,) * _nd)


def nn2_forward_pallas(packed, x, *, tile_n=None, pad_out=None):
    n, d_in = x.shape
    n_layers = packed["w1"].shape[0]
    d_hidden = packed["w_in"].shape[1]
    d_out = packed["d_out"]

    # --- batch tiling: keep tiles big; >=2 grid steps once batch >= 16 so both
    # --- v7x TensorCores get work.  VMEM is never the constraint here.
    MAX_TILE = 2048
    if tile_n is None:
        if n < 16:
            tile_n = n                              # single grid step
        else:
            half_up8 = ((-(-n // 2)) + 7) // 8 * 8  # ceil(n/2) rounded up to 8
            tile_n = min(MAX_TILE, half_up8)

    # Pad batch to a multiple of tile_n (handles non-multiple-of-8 batches).
    n_pad = -(-n // tile_n) * tile_n
    x_run = x if n_pad == n else jnp.pad(x, ((0, n_pad - n), (0, 0)))
    grid = (n_pad // tile_n,)

    # --- output layout: lane-dense padded slab only when the batch is small
    # --- (wasted bytes are noise); compact [N, d_out] otherwise.
    if pad_out is None:
        pad_out = n_pad <= 256
    if pad_out:
        w_out, b_out = packed["w_out_pad"], packed["b_out_pad"]
    else:
        w_out, b_out = packed["w_out"], packed["b_out"]
    d_store = w_out.shape[1]

    args = (x_run, packed["w_in"], packed["b_in"],
            packed["w1"], packed["b1"], packed["w2"], packed["b2"],
            w_out, b_out)

    in_specs = [pl.BlockSpec((tile_n, d_in), lambda i: (i, 0))]
    in_specs += [_const_spec(a) for a in args[1:]]
    out_spec = pl.BlockSpec((tile_n, d_store), lambda i: (i, 0))

    kernel = functools.partial(_nn2_fused_kernel,
                               n_layers=n_layers, inv_h=1.0 / d_hidden)

    y = pl.pallas_call(
        kernel,
        out_shape=jax.ShapeDtypeStruct((n_pad, d_store), jnp.float32),
        grid=grid,
        in_specs=in_specs,
        out_specs=out_spec,
        compiler_params=pltpu.CompilerParams(
            dimension_semantics=("parallel",)),
    )(*args)
    return y[:n, :d_out]


# ------------------------------ params -------------------------------------- #
def init_nn2_params(key, d_in, d_hidden, d_out, n_layers):
    """Matches NN2.__init__ weight init; LN gamma/beta are randomized here
    (torch default is ones/zeros) purely so the affine-folding path is
    exercised by the correctness check."""
    std = jnp.sqrt(1.0 / d_hidden)
    keys = jax.random.split(key, 2 + 6 * n_layers)

    def lin(k, din, dout):
        # stored as [din, dout] (transpose of torch's [dout, din])
        w = std * jax.random.normal(k, (din, dout), dtype=jnp.float32)
        b = jnp.zeros((dout,), dtype=jnp.float32)
        return w, b

    params = {"input": lin(keys[0], d_in, d_hidden)}
    blocks = []
    for ii in range(n_layers):
        k = keys[1 + 6 * ii: 1 + 6 * (ii + 1)]
        w1, b1 = lin(k[0], d_hidden, d_hidden)
        w2, b2 = lin(k[1], d_hidden, d_hidden)
        g1 = 1.0 + 0.1 * jax.random.normal(k[2], (d_hidden,), jnp.float32)
        be1 = 0.1 * jax.random.normal(k[3], (d_hidden,), jnp.float32)
        g2 = 1.0 + 0.1 * jax.random.normal(k[4], (d_hidden,), jnp.float32)
        be2 = 0.1 * jax.random.normal(k[5], (d_hidden,), jnp.float32)
        blocks.append((g1, be1, w1, b1, g2, be2, w2, b2))
    params["blocks"] = blocks
    params["output"] = lin(keys[-1], d_hidden, d_out)
    return params


def pack_nn2_params(params):
    """One-time packing: fold LN affine into the following matmul, stack
    per-block params, 2D-ify vectors, and prepare both compact and lane-padded
    output weights."""
    w_in, b_in = params["input"]
    w_out, b_out = params["output"]
    blocks = params["blocks"]
    h = w_in.shape[1]
    d_out = w_out.shape[1]
    d_out_pad = -(-d_out // 128) * 128   # round up to a multiple of 128 lanes

    w1s, b1s, w2s, b2s = [], [], [], []
    for (g1, be1, w1, b1, g2, be2, w2, b2) in blocks:
        # ln(v) @ W + b == ((v-mu)*rsqrt(var+eps)) @ (g[:,None]*W) + (beta @ W + b)
        w1s.append(g1[:, None] * w1)
        b1s.append((be1 @ w1 + b1)[None, :])
        w2s.append(g2[:, None] * w2)
        b2s.append((be2 @ w2 + b2)[None, :])

    w_out_pad = jnp.zeros((h, d_out_pad), jnp.float32).at[:, :d_out].set(w_out)
    b_out_pad = jnp.zeros((1, d_out_pad), jnp.float32).at[:, :d_out].set(b_out)

    return {
        "w_in": w_in, "b_in": b_in.reshape(1, h),
        "w1": jnp.stack(w1s), "b1": jnp.stack(b1s),    # [L,H,H], [L,1,H]
        "w2": jnp.stack(w2s), "b2": jnp.stack(b2s),
        "w_out": w_out, "b_out": b_out.reshape(1, d_out),
        "w_out_pad": w_out_pad, "b_out_pad": b_out_pad,
        "d_out": d_out,
    }


# ------------------------------ pure-JAX reference --------------------------- #
def nn2_forward_reference(params, x):
    def ln(v, g, b):
        mu = jnp.mean(v, axis=-1, keepdims=True)
        var = jnp.mean((v - mu) ** 2, axis=-1, keepdims=True)
        return (v - mu) * jax.lax.rsqrt(var + _LN_EPS) * g + b

    w_in, b_in = params["input"]
    h = x @ w_in + b_in
    for (g1, be1, w1, b1, g2, be2, w2, b2) in params["blocks"]:
        identity = h
        o = ln(h, g1, be1)
        o = jnp.tanh(o @ w1 + b1)
        o = ln(o, g2, be2)
        o = o @ w2 + b2 + identity
        h = jnp.tanh(o)
    w_out, b_out = params["output"]
    return h @ w_out + b_out


# ------------------------------ main ----------------------------------------- #
if __name__ == "__main__":
    # NN2(neurons_per_layer=[4, 32, 2], n_layers=3, act_fn=tanh)
    d_in, d_hidden, d_out = 4, 32, 2
    n_layers = 3

    key = jax.random.PRNGKey(0)
    k_params, k_x = jax.random.split(key)
    params = init_nn2_params(k_params, d_in, d_hidden, d_out, n_layers)
    packed = pack_nn2_params(params)

    # batch=8  : single grid step, lane-dense padded output slab.
    # batch=100: non-multiple-of-8 batch (wrapper pads), 2 grid steps.
    # batch=384: 2 grid steps, compact (unpadded) output write path.
    for batch in (8, 100, 384):
        kx = jax.random.fold_in(k_x, batch)
        x = jax.random.normal(kx, (batch, d_in), dtype=jnp.float32)

        y = jax.block_until_ready(nn2_forward_pallas(packed, x))
        y_ref = nn2_forward_reference(params, x)

        assert y.shape == (batch, d_out)
        # Affine folding and one-pass variance reassociate rounding slightly;
        # 1e-4 is a comfortable bound for this f32 path.
        assert jnp.allclose(y, y_ref, atol=1e-4, rtol=1e-4), \
            f"mismatch vs reference at batch={batch}"

    print("KERNEL_OK")
</pallas_src>

<mosaic_0001>
module attributes {stable_mosaic.version = 11 : i64} {
  func.func @_nn2_fused_kernel(%arg0: i32, %arg1: memref<8x4xf32, #tpu.memory_space<vmem>>, %arg2: memref<4x32xf32, #tpu.memory_space<vmem>>, %arg3: memref<1x32xf32, #tpu.memory_space<vmem>>, %arg4: memref<3x32x32xf32, #tpu.memory_space<vmem>>, %arg5: memref<3x1x32xf32, #tpu.memory_space<vmem>>, %arg6: memref<3x32x32xf32, #tpu.memory_space<vmem>>, %arg7: memref<3x1x32xf32, #tpu.memory_space<vmem>>, %arg8: memref<32x128xf32, #tpu.memory_space<vmem>>, %arg9: memref<1x128xf32, #tpu.memory_space<vmem>>, %arg10: memref<8x128xf32, #tpu.memory_space<vmem>>) attributes {dimension_semantics = [#tpu.dimension_semantics<parallel>], iteration_bounds = array<i64: 1>, scalar_prefetch = 0 : i64, scratch_operands = 0 : i64, tpu.core_type = #tpu.core_type<tc>, window_params = [{transform_indices = @transform_0, window_bounds = array<i64: 8, 4>}, {pipeline_mode = #tpu.pipeline_mode<synchronous>, transform_indices = @transform_1, window_bounds = array<i64: 4, 32>}, {pipeline_mode = #tpu.pipeline_mode<synchronous>, transform_indices = @transform_2, window_bounds = array<i64: 1, 32>}, {pipeline_mode = #tpu.pipeline_mode<synchronous>, transform_indices = @transform_3, window_bounds = array<i64: 3, 32, 32>}, {pipeline_mode = #tpu.pipeline_mode<synchronous>, transform_indices = @transform_4, window_bounds = array<i64: 3, 1, 32>}, {pipeline_mode = #tpu.pipeline_mode<synchronous>, transform_indices = @transform_5, window_bounds = array<i64: 3, 32, 32>}, {pipeline_mode = #tpu.pipeline_mode<synchronous>, transform_indices = @transform_6, window_bounds = array<i64: 3, 1, 32>}, {pipeline_mode = #tpu.pipeline_mode<synchronous>, transform_indices = @transform_7, window_bounds = array<i64: 32, 128>}, {pipeline_mode = #tpu.pipeline_mode<synchronous>, transform_indices = @transform_8, window_bounds = array<i64: 1, 128>}, {transform_indices = @transform_9, window_bounds = array<i64: 8, 128>}]} {
    %c0 = arith.constant 0 : index
    %c0_0 = arith.constant 0 : index
    %0 = vector.load %arg1[%c0, %c0_0] : memref<8x4xf32, #tpu.memory_space<vmem>>, vector<8x4xf32>
    %c0_1 = arith.constant 0 : index
    %c0_2 = arith.constant 0 : index
    %1 = vector.load %arg2[%c0_1, %c0_2] : memref<4x32xf32, #tpu.memory_space<vmem>>, vector<4x32xf32>
    %cst = arith.constant dense<0.000000e+00> : vector<8x32xf32>
    %2 = tpu.matmul %0, %1, %cst {dimension_numbers = #tpu.dot_dimension_numbers<[1], [0], [0], [1], [0, 0, 1, 1], [], []>} : vector<8x4xf32>, vector<4x32xf32>, vector<8x32xf32> -> vector<8x32xf32>
    %c0_3 = arith.constant 0 : index
    %c0_4 = arith.constant 0 : index
    %3 = vector.load %arg3[%c0_3, %c0_4] : memref<1x32xf32, #tpu.memory_space<vmem>>, vector<1x32xf32>
    %4 = vector.broadcast %3 : vector<1x32xf32> to vector<8x32xf32>
    %5 = arith.addf %2, %4 : vector<8x32xf32>
    %cst_5 = arith.constant dense<0.000000e+00> : vector<8xf32>
    %6 = vector.multi_reduction <add>, %5, %cst_5 [1] : vector<8x32xf32> to vector<8xf32>
    %7 = vector.shape_cast %6 : vector<8xf32> to vector<8x1xf32>
    %8 = arith.mulf %5, %5 : vector<8x32xf32>
    %cst_6 = arith.constant dense<0.000000e+00> : vector<8xf32>
    %9 = vector.multi_reduction <add>, %8, %cst_6 [1] : vector<8x32xf32> to vector<8xf32>
    %10 = vector.shape_cast %9 : vector<8xf32> to vector<8x1xf32>
    %cst_7 = arith.constant 3.125000e-02 : f32
    %11 = vector.broadcast %cst_7 : f32 to vector<8x1xf32>
    %12 = arith.mulf %7, %11 : vector<8x1xf32>
    %cst_8 = arith.constant 3.125000e-02 : f32
    %13 = vector.broadcast %cst_8 : f32 to vector<8x1xf32>
    %14 = arith.mulf %10, %13 : vector<8x1xf32>
    %15 = arith.mulf %12, %12 : vector<8x1xf32>
    %16 = arith.subf %14, %15 : vector<8x1xf32>
    %17 = vector.broadcast %12 : vector<8x1xf32> to vector<8x32xf32>
    %18 = arith.subf %5, %17 : vector<8x32xf32>
    %cst_9 = arith.constant 9.99999974E-6 : f32
    %19 = vector.broadcast %cst_9 : f32 to vector<8x1xf32>
    %20 = arith.addf %16, %19 : vector<8x1xf32>
    %21 = math.rsqrt %20 : vector<8x1xf32>
    %22 = vector.broadcast %21 : vector<8x1xf32> to vector<8x32xf32>
    %23 = arith.mulf %18, %22 : vector<8x32xf32>
    %c0_10 = arith.constant 0 : index
    %c0_11 = arith.constant 0 : index
    %c0_12 = arith.constant 0 : index
    %24 = vector.load %arg4[%c0_10, %c0_11, %c0_12] : memref<3x32x32xf32, #tpu.memory_space<vmem>>, vector<1x32x32xf32>
    %25 = vector.shape_cast %24 : vector<1x32x32xf32> to vector<32x32xf32>
    %cst_13 = arith.constant dense<0.000000e+00> : vector<8x32xf32>
    %26 = tpu.matmul %23, %25, %cst_13 {dimension_numbers = #tpu.dot_dimension_numbers<[1], [0], [0], [1], [0, 0, 1, 1], [], []>} : vector<8x32xf32>, vector<32x32xf32>, vector<8x32xf32> -> vector<8x32xf32>
    %c0_14 = arith.constant 0 : index
    %c0_15 = arith.constant 0 : index
    %c0_16 = arith.constant 0 : index
    %27 = vector.load %arg5[%c0_14, %c0_15, %c0_16] : memref<3x1x32xf32, #tpu.memory_space<vmem>>, vector<1x1x32xf32>
    %28 = vector.shape_cast %27 : vector<1x1x32xf32> to vector<1x32xf32>
    %29 = vector.broadcast %28 : vector<1x32xf32> to vector<8x32xf32>
    %30 = arith.addf %26, %29 : vector<8x32xf32>
    %31 = math.tanh %30 : vector<8x32xf32>
    %cst_17 = arith.constant dense<0.000000e+00> : vector<8xf32>
    %32 = vector.multi_reduction <add>, %31, %cst_17 [1] : vector<8x32xf32> to vector<8xf32>
    %33 = vector.shape_cast %32 : vector<8xf32> to vector<8x1xf32>
    %34 = arith.mulf %31, %31 : vector<8x32xf32>
    %cst_18 = arith.constant dense<0.000000e+00> : vector<8xf32>
    %35 = vector.multi_reduction <add>, %34, %cst_18 [1] : vector<8x32xf32> to vector<8xf32>
    %36 = vector.shape_cast %35 : vector<8xf32> to vector<8x1xf32>
    %cst_19 = arith.constant 3.125000e-02 : f32
    %37 = vector.broadcast %cst_19 : f32 to vector<8x1xf32>
    %38 = arith.mulf %33, %37 : vector<8x1xf32>
    %cst_20 = arith.constant 3.125000e-02 : f32
    %39 = vector.broadcast %cst_20 : f32 to vector<8x1xf32>
    %40 = arith.mulf %36, %39 : vector<8x1xf32>
    %41 = arith.mulf %38, %38 : vector<8x1xf32>
    %42 = arith.subf %40, %41 : vector<8x1xf32>
    %43 = vector.broadcast %38 : vector<8x1xf32> to vector<8x32xf32>
    %44 = arith.subf %31, %43 : vector<8x32xf32>
    %cst_21 = arith.constant 9.99999974E-6 : f32
    %45 = vector.broadcast %cst_21 : f32 to vector<8x1xf32>
    %46 = arith.addf %42, %45 : vector<8x1xf32>
    %47 = math.rsqrt %46 : vector<8x1xf32>
    %48 = vector.broadcast %47 : vector<8x1xf32> to vector<8x32xf32>
    %49 = arith.mulf %44, %48 : vector<8x32xf32>
    %c0_22 = arith.constant 0 : index
    %c0_23 = arith.constant 0 : index
    %c0_24 = arith.constant 0 : index
    %50 = vector.load %arg6[%c0_22, %c0_23, %c0_24] : memref<3x32x32xf32, #tpu.memory_space<vmem>>, vector<1x32x32xf32>
    %51 = vector.shape_cast %50 : vector<1x32x32xf32> to vector<32x32xf32>
    %cst_25 = arith.constant dense<0.000000e+00> : vector<8x32xf32>
    %52 = tpu.matmul %49, %51, %cst_25 {dimension_numbers = #tpu.dot_dimension_numbers<[1], [0], [0], [1], [0, 0, 1, 1], [], []>} : vector<8x32xf32>, vector<32x32xf32>, vector<8x32xf32> -> vector<8x32xf32>
    %c0_26 = arith.constant 0 : index
    %c0_27 = arith.constant 0 : index
    %c0_28 = arith.constant 0 : index
    %53 = vector.load %arg7[%c0_26, %c0_27, %c0_28] : memref<3x1x32xf32, #tpu.memory_space<vmem>>, vector<1x1x32xf32>
    %54 = vector.shape_cast %53 : vector<1x1x32xf32> to vector<1x32xf32>
    %55 = vector.broadcast %54 : vector<1x32xf32> to vector<8x32xf32>
    %56 = arith.addf %52, %55 : vector<8x32xf32>
    %57 = arith.addf %56, %5 : vector<8x32xf32>
    %58 = math.tanh %57 : vector<8x32xf32>
    %cst_29 = arith.constant dense<0.000000e+00> : vector<8xf32>
    %59 = vector.multi_reduction <add>, %58, %cst_29 [1] : vector<8x32xf32> to vector<8xf32>
    %60 = vector.shape_cast %59 : vector<8xf32> to vector<8x1xf32>
    %61 = arith.mulf %58, %58 : vector<8x32xf32>
    %cst_30 = arith.constant dense<0.000000e+00> : vector<8xf32>
    %62 = vector.multi_reduction <add>, %61, %cst_30 [1] : vector<8x32xf32> to vector<8xf32>
    %63 = vector.shape_cast %62 : vector<8xf32> to vector<8x1xf32>
    %cst_31 = arith.constant 3.125000e-02 : f32
    %64 = vector.broadcast %cst_31 : f32 to vector<8x1xf32>
    %65 = arith.mulf %60, %64 : vector<8x1xf32>
    %cst_32 = arith.constant 3.125000e-02 : f32
    %66 = vector.broadcast %cst_32 : f32 to vector<8x1xf32>
    %67 = arith.mulf %63, %66 : vector<8x1xf32>
    %68 = arith.mulf %65, %65 : vector<8x1xf32>
    %69 = arith.subf %67, %68 : vector<8x1xf32>
    %70 = vector.broadcast %65 : vector<8x1xf32> to vector<8x32xf32>
    %71 = arith.subf %58, %70 : vector<8x32xf32>
    %cst_33 = arith.constant 9.99999974E-6 : f32
    %72 = vector.broadcast %cst_33 : f32 to vector<8x1xf32>
    %73 = arith.addf %69, %72 : vector<8x1xf32>
    %74 = math.rsqrt %73 : vector<8x1xf32>
    %75 = vector.broadcast %74 : vector<8x1xf32> to vector<8x32xf32>
    %76 = arith.mulf %71, %75 : vector<8x32xf32>
    %c1 = arith.constant 1 : index
    %c0_34 = arith.constant 0 : index
    %c0_35 = arith.constant 0 : index
    %77 = vector.load %arg4[%c1, %c0_34, %c0_35] : memref<3x32x32xf32, #tpu.memory_space<vmem>>, vector<1x32x32xf32>
    %78 = vector.shape_cast %77 : vector<1x32x32xf32> to vector<32x32xf32>
    %cst_36 = arith.constant dense<0.000000e+00> : vector<8x32xf32>
    %79 = tpu.matmul %76, %78, %cst_36 {dimension_numbers = #tpu.dot_dimension_numbers<[1], [0], [0], [1], [0, 0, 1, 1], [], []>} : vector<8x32xf32>, vector<32x32xf32>, vector<8x32xf32> -> vector<8x32xf32>
    %c1_37 = arith.constant 1 : index
    %c0_38 = arith.constant 0 : index
    %c0_39 = arith.constant 0 : index
    %80 = vector.load %arg5[%c1_37, %c0_38, %c0_39] : memref<3x1x32xf32, #tpu.memory_space<vmem>>, vector<1x1x32xf32>
    %81 = vector.shape_cast %80 : vector<1x1x32xf32> to vector<1x32xf32>
    %82 = vector.broadcast %81 : vector<1x32xf32> to vector<8x32xf32>
    %83 = arith.addf %79, %82 : vector<8x32xf32>
    %84 = math.tanh %83 : vector<8x32xf32>
    %cst_40 = arith.constant dense<0.000000e+00> : vector<8xf32>
    %85 = vector.multi_reduction <add>, %84, %cst_40 [1] : vector<8x32xf32> to vector<8xf32>
    %86 = vector.shape_cast %85 : vector<8xf32> to vector<8x1xf32>
    %87 = arith.mulf %84, %84 : vector<8x32xf32>
    %cst_41 = arith.constant dense<0.000000e+00> : vector<8xf32>
    %88 = vector.multi_reduction <add>, %87, %cst_41 [1] : vector<8x32xf32> to vector<8xf32>
    %89 = vector.shape_cast %88 : vector<8xf32> to vector<8x1xf32>
    %cst_42 = arith.constant 3.125000e-02 : f32
    %90 = vector.broadcast %cst_42 : f32 to vector<8x1xf32>
    %91 = arith.mulf %86, %90 : vector<8x1xf32>
    %cst_43 = arith.constant 3.125000e-02 : f32
    %92 = vector.broadcast %cst_43 : f32 to vector<8x1xf32>
    %93 = arith.mulf %89, %92 : vector<8x1xf32>
    %94 = arith.mulf %91, %91 : vector<8x1xf32>
    %95 = arith.subf %93, %94 : vector<8x1xf32>
    %96 = vector.broadcast %91 : vector<8x1xf32> to vector<8x32xf32>
    %97 = arith.subf %84, %96 : vector<8x32xf32>
    %cst_44 = arith.constant 9.99999974E-6 : f32
    %98 = vector.broadcast %cst_44 : f32 to vector<8x1xf32>
    %99 = arith.addf %95, %98 : vector<8x1xf32>
    %100 = math.rsqrt %99 : vector<8x1xf32>
    %101 = vector.broadcast %100 : vector<8x1xf32> to vector<8x32xf32>
    %102 = arith.mulf %97, %101 : vector<8x32xf32>
    %c1_45 = arith.constant 1 : index
    %c0_46 = arith.constant 0 : index
    %c0_47 = arith.constant 0 : index
    %103 = vector.load %arg6[%c1_45, %c0_46, %c0_47] : memref<3x32x32xf32, #tpu.memory_space<vmem>>, vector<1x32x32xf32>
    %104 = vector.shape_cast %103 : vector<1x32x32xf32> to vector<32x32xf32>
    %cst_48 = arith.constant dense<0.000000e+00> : vector<8x32xf32>
    %105 = tpu.matmul %102, %104, %cst_48 {dimension_numbers = #tpu.dot_dimension_numbers<[1], [0], [0], [1], [0, 0, 1, 1], [], []>} : vector<8x32xf32>, vector<32x32xf32>, vector<8x32xf32> -> vector<8x32xf32>
    %c1_49 = arith.constant 1 : index
    %c0_50 = arith.constant 0 : index
    %c0_51 = arith.constant 0 : index
    %106 = vector.load %arg7[%c1_49, %c0_50, %c0_51] : memref<3x1x32xf32, #tpu.memory_space<vmem>>, vector<1x1x32xf32>
    %107 = vector.shape_cast %106 : vector<1x1x32xf32> to vector<1x32xf32>
    %108 = vector.broadcast %107 : vector<1x32xf32> to vector<8x32xf32>
    %109 = arith.addf %105, %108 : vector<8x32xf32>
    %110 = arith.addf %109, %58 : vector<8x32xf32>
    %111 = math.tanh %110 : vector<8x32xf32>
    %cst_52 = arith.constant dense<0.000000e+00> : vector<8xf32>
    %112 = vector.multi_reduction <add>, %111, %cst_52 [1] : vector<8x32xf32> to vector<8xf32>
    %113 = vector.shape_cast %112 : vector<8xf32> to vector<8x1xf32>
    %114 = arith.mulf %111, %111 : vector<8x32xf32>
    %cst_53 = arith.constant dense<0.000000e+00> : vector<8xf32>
    %115 = vector.multi_reduction <add>, %114, %cst_53 [1] : vector<8x32xf32> to vector<8xf32>
    %116 = vector.shape_cast %115 : vector<8xf32> to vector<8x1xf32>
    %cst_54 = arith.constant 3.125000e-02 : f32
    %117 = vector.broadcast %cst_54 : f32 to vector<8x1xf32>
    %118 = arith.mulf %113, %117 : vector<8x1xf32>
    %cst_55 = arith.constant 3.125000e-02 : f32
    %119 = vector.broadcast %cst_55 : f32 to vector<8x1xf32>
    %120 = arith.mulf %116, %119 : vector<8x1xf32>
    %121 = arith.mulf %118, %118 : vector<8x1xf32>
    %122 = arith.subf %120, %121 : vector<8x1xf32>
    %123 = vector.broadcast %118 : vector<8x1xf32> to vector<8x32xf32>
    %124 = arith.subf %111, %123 : vector<8x32xf32>
    %cst_56 = arith.constant 9.99999974E-6 : f32
    %125 = vector.broadcast %cst_56 : f32 to vector<8x1xf32>
    %126 = arith.addf %122, %125 : vector<8x1xf32>
    %127 = math.rsqrt %126 : vector<8x1xf32>
    %128 = vector.broadcast %127 : vector<8x1xf32> to vector<8x32xf32>
    %129 = arith.mulf %124, %128 : vector<8x32xf32>
    %c2 = arith.constant 2 : index
    %c0_57 = arith.constant 0 : index
    %c0_58 = arith.constant 0 : index
    %130 = vector.load %arg4[%c2, %c0_57, %c0_58] : memref<3x32x32xf32, #tpu.memory_space<vmem>>, vector<1x32x32xf32>
    %131 = vector.shape_cast %130 : vector<1x32x32xf32> to vector<32x32xf32>
    %cst_59 = arith.constant dense<0.000000e+00> : vector<8x32xf32>
    %132 = tpu.matmul %129, %131, %cst_59 {dimension_numbers = #tpu.dot_dimension_numbers<[1], [0], [0], [1], [0, 0, 1, 1], [], []>} : vector<8x32xf32>, vector<32x32xf32>, vector<8x32xf32> -> vector<8x32xf32>
    %c2_60 = arith.constant 2 : index
    %c0_61 = arith.constant 0 : index
    %c0_62 = arith.constant 0 : index
    %133 = vector.load %arg5[%c2_60, %c0_61, %c0_62] : memref<3x1x32xf32, #tpu.memory_space<vmem>>, vector<1x1x32xf32>
    %134 = vector.shape_cast %133 : vector<1x1x32xf32> to vector<1x32xf32>
    %135 = vector.broadcast %134 : vector<1x32xf32> to vector<8x32xf32>
    %136 = arith.addf %132, %135 : vector<8x32xf32>
    %137 = math.tanh %136 : vector<8x32xf32>
    %cst_63 = arith.constant dense<0.000000e+00> : vector<8xf32>
    %138 = vector.multi_reduction <add>, %137, %cst_63 [1] : vector<8x32xf32> to vector<8xf32>
    %139 = vector.shape_cast %138 : vector<8xf32> to vector<8x1xf32>
    %140 = arith.mulf %137, %137 : vector<8x32xf32>
    %cst_64 = arith.constant dense<0.000000e+00> : vector<8xf32>
    %141 = vector.multi_reduction <add>, %140, %cst_64 [1] : vector<8x32xf32> to vector<8xf32>
    %142 = vector.shape_cast %141 : vector<8xf32> to vector<8x1xf32>
    %cst_65 = arith.constant 3.125000e-02 : f32
    %143 = vector.broadcast %cst_65 : f32 to vector<8x1xf32>
    %144 = arith.mulf %139, %143 : vector<8x1xf32>
    %cst_66 = arith.constant 3.125000e-02 : f32
    %145 = vector.broadcast %cst_66 : f32 to vector<8x1xf32>
    %146 = arith.mulf %142, %145 : vector<8x1xf32>
    %147 = arith.mulf %144, %144 : vector<8x1xf32>
    %148 = arith.subf %146, %147 : vector<8x1xf32>
    %149 = vector.broadcast %144 : vector<8x1xf32> to vector<8x32xf32>
    %150 = arith.subf %137, %149 : vector<8x32xf32>
    %cst_67 = arith.constant 9.99999974E-6 : f32
    %151 = vector.broadcast %cst_67 : f32 to vector<8x1xf32>
    %152 = arith.addf %148, %151 : vector<8x1xf32>
    %153 = math.rsqrt %152 : vector<8x1xf32>
    %154 = vector.broadcast %153 : vector<8x1xf32> to vector<8x32xf32>
    %155 = arith.mulf %150, %154 : vector<8x32xf32>
    %c2_68 = arith.constant 2 : index
    %c0_69 = arith.constant 0 : index
    %c0_70 = arith.constant 0 : index
    %156 = vector.load %arg6[%c2_68, %c0_69, %c0_70] : memref<3x32x32xf32, #tpu.memory_space<vmem>>, vector<1x32x32xf32>
    %157 = vector.shape_cast %156 : vector<1x32x32xf32> to vector<32x32xf32>
    %cst_71 = arith.constant dense<0.000000e+00> : vector<8x32xf32>
    %158 = tpu.matmul %155, %157, %cst_71 {dimension_numbers = #tpu.dot_dimension_numbers<[1], [0], [0], [1], [0, 0, 1, 1], [], []>} : vector<8x32xf32>, vector<32x32xf32>, vector<8x32xf32> -> vector<8x32xf32>
    %c2_72 = arith.constant 2 : index
    %c0_73 = arith.constant 0 : index
    %c0_74 = arith.constant 0 : index
    %159 = vector.load %arg7[%c2_72, %c0_73, %c0_74] : memref<3x1x32xf32, #tpu.memory_space<vmem>>, vector<1x1x32xf32>
    %160 = vector.shape_cast %159 : vector<1x1x32xf32> to vector<1x32xf32>
    %161 = vector.broadcast %160 : vector<1x32xf32> to vector<8x32xf32>
    %162 = arith.addf %158, %161 : vector<8x32xf32>
    %163 = arith.addf %162, %111 : vector<8x32xf32>
    %164 = math.tanh %163 : vector<8x32xf32>
    %c0_75 = arith.constant 0 : index
    %c0_76 = arith.constant 0 : index
    %165 = vector.load %arg8[%c0_75, %c0_76] : memref<32x128xf32, #tpu.memory_space<vmem>>, vector<32x128xf32>
    %cst_77 = arith.constant dense<0.000000e+00> : vector<8x128xf32>
    %166 = tpu.matmul %164, %165, %cst_77 {dimension_numbers = #tpu.dot_dimension_numbers<[1], [0], [0], [1], [0, 0, 1, 1], [], []>} : vector<8x32xf32>, vector<32x128xf32>, vector<8x128xf32> -> vector<8x128xf32>
    %c0_78 = arith.constant 0 : index
    %c0_79 = arith.constant 0 : index
    %167 = vector.load %arg9[%c0_78, %c0_79] : memref<1x128xf32, #tpu.memory_space<vmem>>, vector<1x128xf32>
    %168 = vector.broadcast %167 : vector<1x128xf32> to vector<8x128xf32>
    %169 = arith.addf %166, %168 : vector<8x128xf32>
    %c0_80 = arith.constant 0 : index
    %c0_81 = arith.constant 0 : index
    %170 = vector.load %arg10[%c0_80, %c0_81] : memref<8x128xf32, #tpu.memory_space<vmem>>, vector<8x128xf32>
    tpu.vector_store %arg10[%c0_80, %c0_81], %169 {strides = array<i32>} : memref<8x128xf32, #tpu.memory_space<vmem>>, vector<8x128xf32>,
    return
  }
  func.func @transform_0(%arg0: i32) -> (i32, i32) {
    %c0_i32 = arith.constant 0 : i32
    %c0_i32_0 = arith.constant 0 : i32
    return %arg0, %c0_i32 : i32, i32
  }
  func.func @transform_1(%arg0: i32) -> (i32, i32) {
    %c0_i32 = arith.constant 0 : i32
    %c0_i32_0 = arith.constant 0 : i32
    %c0_i32_1 = arith.constant 0 : i32
    return %c0_i32, %c0_i32_0 : i32, i32
  }
  func.func @transform_2(%arg0: i32) -> (i32, i32) {
    %c0_i32 = arith.constant 0 : i32
    %c0_i32_0 = arith.constant 0 : i32
    %c0_i32_1 = arith.constant 0 : i32
    return %c0_i32, %c0_i32_0 : i32, i32
  }
  func.func @transform_3(%arg0: i32) -> (i32, i32, i32) {
    %c0_i32 = arith.constant 0 : i32
    %c0_i32_0 = arith.constant 0 : i32
    %c0_i32_1 = arith.constant 0 : i32
    %c0_i32_2 = arith.constant 0 : i32
    return %c0_i32, %c0_i32_0, %c0_i32_1 : i32, i32, i32
  }
  func.func @transform_4(%arg0: i32) -> (i32, i32, i32) {
    %c0_i32 = arith.constant 0 : i32
    %c0_i32_0 = arith.constant 0 : i32
    %c0_i32_1 = arith.constant 0 : i32
    %c0_i32_2 = arith.constant 0 : i32
    return %c0_i32, %c0_i32_0, %c0_i32_1 : i32, i32, i32
  }
  func.func @transform_5(%arg0: i32) -> (i32, i32, i32) {
    %c0_i32 = arith.constant 0 : i32
    %c0_i32_0 = arith.constant 0 : i32
    %c0_i32_1 = arith.constant 0 : i32
    %c0_i32_2 = arith.constant 0 : i32
    return %c0_i32, %c0_i32_0, %c0_i32_1 : i32, i32, i32
  }
  func.func @transform_6(%arg0: i32) -> (i32, i32, i32) {
    %c0_i32 = arith.constant 0 : i32
    %c0_i32_0 = arith.constant 0 : i32
    %c0_i32_1 = arith.constant 0 : i32
    %c0_i32_2 = arith.constant 0 : i32
    return %c0_i32, %c0_i32_0, %c0_i32_1 : i32, i32, i32
  }
  func.func @transform_7(%arg0: i32) -> (i32, i32) {
    %c0_i32 = arith.constant 0 : i32
    %c0_i32_0 = arith.constant 0 : i32
    %c0_i32_1 = arith.constant 0 : i32
    return %c0_i32, %c0_i32_0 : i32, i32
  }
  func.func @transform_8(%arg0: i32) -> (i32, i32) {
    %c0_i32 = arith.constant 0 : i32
    %c0_i32_0 = arith.constant 0 : i32
    %c0_i32_1 = arith.constant 0 : i32
    return %c0_i32, %c0_i32_0 : i32, i32
  }
  func.func @transform_9(%arg0: i32) -> (i32, i32) {
    %c0_i32 = arith.constant 0 : i32
    %c0_i32_0 = arith.constant 0 : i32
    return %arg0, %c0_i32 : i32, i32
  }
}

</mosaic_0001>

<bundles_post_ra>
// kernel: tpu_custom_call.1
= control target key start
LH: loop header
LB: loop body
LE: loop exit
PB: predicated region body
PF: predicated region fallthrough
CT: control target
= control target key end

     0   :  { %14 = vsyncpa [#allocation3], 0  ;;  %s1317_s0 = inlined_call_operand.vmem [shape: f32[8,4], index: 0, kind: input, shape index: {}]   ;;  %s1318_s1 = inlined_call_operand.vmem [shape: f32[4,32], index: 1, kind: input, shape index: {}]   ;;  %s1319_s2 = inlined_call_operand.vmem [shape: f32[1,32], index: 2, kind: input, shape index: {}]   ;;  %s1320_s3 = inlined_call_operand.hbm [shape: f32[3,32,32], index: 3, kind: input, shape index: {}]   ;;  %s1321_s4 = inlined_call_operand.vmem [shape: f32[3,1,32], index: 4, kind: input, shape index: {}]   ;;  %s1322_s5 = inlined_call_operand.hbm [shape: f32[3,32,32], index: 5, kind: input, shape index: {}]   ;;  %s1323_s6 = inlined_call_operand.vmem [shape: f32[3,1,32], index: 6, kind: input, shape index: {}]   ;;  %s1324_s7 = inlined_call_operand.hbm [shape: f32[32,128], index: 7, kind: input, shape index: {}]   ;;  %s1325_s8 = inlined_call_operand.vmem [shape: f32[1,128], index: 8, kind: input, shape index: {}]   ;;  %s1326_s9 = inlined_call_operand.hbm [shape: f32[8,128], index: 9, kind: output, shape index: {}]  }
   0x1   :  { %15 = vsyncpa [#allocation6], 0 }
   0x2   :  { %16 = vsyncpa [#allocation4], 0  ;;  %s1132_s30 = smov [#allocation5]   ;;  %s1133_s11 = smov [#allocation2]  }
   0x3   :  { %s42_s10 = sshll.u32 %s1132_s30, 4  ;;  %s28_s12 = sshll.u32 %s1133_s11, 4  ;;  %s43_s10 = int_to_ptr.vmem [resolvable:$true] %s42_s10  ;;  %s29_s12 = int_to_ptr.vmem [resolvable:$true] %s28_s12 }
   0x4   :  { %s1054_s13 = scalar_lea.vmem %s43_s10, 1536  ;;  %p1059_p1 = scmp.lt.s32.totalorder %s43_s10, %s43_s10 }
   0x5   :  { %p1055_p0 = scmp.ne.s32.totalorder %s43_s10, %s1054_s13  ;;  %p1060_p2 = scmp.lt.s32.totalorder %s1054_s13, %s1054_s13 }
   0x7   :  { %p1061_p3 = por %p1060_p2, %p1059_p1 }
   0x9   :  { %p1062_p4 = pnand %p1061_p3, %p1055_p0 }
   0xb   :  { %1065 = shalt.err (!%p1062_p4)
}
   0xc   :  { %s1134_s14 = smov 128   ;;  %s1135_s15 = smov 8  }
   0xd   :  { %48 = dma.hbm_to_vmem [thread:$0]  %s1322_s5, 1536, %s43_s10, [#allocation6], %s1134_s14, %s1134_s14, %s1135_s15  }
   0xe   :  { %s1074_s18 = scalar_lea.vmem %s29_s12, 1536  ;;  %p1079_p6 = scmp.lt.s32.totalorder %s29_s12, %s29_s12 }
   0xf   :  { %p1075_p5 = scmp.ne.s32.totalorder %s29_s12, %s1074_s18  ;;  %p1080_p7 = scmp.lt.s32.totalorder %s1074_s18, %s1074_s18 }
  0x11   :  { %p1081_p8 = por %p1080_p7, %p1079_p6 }
  0x13   :  { %p1082_p9 = pnand %p1081_p8, %p1075_p5 }
  0x15   :  { %1085 = shalt.err (!%p1082_p9)
}
  0x16   :  { %34 = dma.hbm_to_vmem [thread:$0]  %s1320_s3, 1536, %s29_s12, [#allocation3], %s1134_s14, %s1134_s14, %s1135_s15  }
  0x17   :  { %s1136_s21 = smov [#allocation7]  }
  0x18   :  { %s56_s22 = sshll.u32 %s1136_s21, 4  ;;  %s57_s22 = int_to_ptr.vmem [resolvable:$true] %s56_s22 }
  0x19   :  { %s1094_s23 = scalar_lea.vmem %s57_s22, 512  ;;  %p1099_p11 = scmp.lt.s32.totalorder %s57_s22, %s57_s22 }
  0x1a   :  { %p1095_p10 = scmp.ne.s32.totalorder %s57_s22, %s1094_s23  ;;  %p1100_p12 = scmp.lt.s32.totalorder %s1094_s23, %s1094_s23 }
  0x1c   :  { %p1101_p13 = por %p1100_p12, %p1099_p11 }
  0x1e   :  { %p1102_p0 = pnand %p1101_p13, %p1095_p10 }
  0x20   :  { %1105 = shalt.err (!%p1102_p0)
}
  0x21   :  { %62 = dma.hbm_to_vmem [thread:$0]  %s1324_s7, 512, %s57_s22, [#allocation6], %s1134_s14, %s1134_s14, %s1135_s15  }
  0x22   :  { %1126 = dma.done.wait [#allocation3], 1536  }
  0x23   :  { %1127 = vsyncadd [#allocation3], 4294965760 }
  0x24   :  { %1128 = dma.done.wait [#allocation6], 2048  }
  0x25   :  { %1129 = vsyncadd [#allocation6], 4294965248  ;;  %v1137_v0 = vmov 0.0   ;;  %vm1138_vm0 = vmmov 0   ;;  %vm87_vm1 = vcmask 1043456   ;;  %vm83_vm2 = vcmask 31744  }
  0x26   :  { %932 = vmatprep.subr.mxu0 %v1137_v0  ;;  %934 = vmatprep.mubr.msk.f32.mxu0 %vm1138_vm0, %v1137_v0  ;;  %v75_v1 = vld [vmem:[%s1318_s1] sm:$0xf]  ;;  %vm161_vm3 = vcmask 261120   ;;  %v180_v10 = vld [vmem:[#allocation2 + $0x18] sm:$0xff]  ;;  %v179_v11 = vld [vmem:[#allocation2 + $0x10] sm:$0xff]  ;;  %s1139_s18 = smov [#allocation8]  }
  0x27   :  { %937 = vmatprep.subr.mxu1 %v1137_v0  ;;  %945 = vmatprep.mubr.msk.f32.mxu1 %vm1138_vm0, %v1137_v0  ;;  %v74_v2 = vld [vmem:[%s1317_s0] sm:$0xff]  ;;  %v178_v12 = vld [vmem:[#allocation2 + $0x8] sm:$0xff]  ;;  %v280_v32 = vld [vmem:[#allocation5 + $0x18] sm:$0xff]  ;;  %s864_s19 = sshll.u32 %s1139_s18, 4  ;;  %s865_s19 = int_to_ptr.vmem [resolvable:$true] %s864_s19 }
  0x28   :  { %933 = vmatpush3.msk.msra.mxu0 %vm87_vm1, %v75_v1  ;;  %v874_v3 = vld [vmem:[%s1319_s2] ss:$0 sm:$0xff]  ;;  %938 = vmatpush3.msra.mxu1 %v180_v10  ;;  %v279_v33 = vld [vmem:[#allocation5 + $0x10] sm:$0xff]  ;;  %v278_v34 = vld [vmem:[#allocation5 + $0x8] sm:$0xff]  ;;  %p1111_p2 = scmp.lt.s32.totalorder %s865_s19, %s865_s19 }
  0x29   :  { %935 = vmatmul.mubr.msk.f32.vlgmr.msra.gmra.mxu0 %vm83_vm2, %v74_v2  ;;  %948 = vmatprep.subr.mxu0 %v1137_v0  ;;  %v177_v13 = vld [vmem:[#allocation2] sm:$0xff]  ;;  %v382_v55 = vld [vmem:[#allocation2 + $0x38] sm:$0xff]  ;;  %v381_v56 = vld [vmem:[#allocation2 + $0x30] sm:$0xff] }
  0x2a   :  { %956 = vmatprep.mubr.msk.f32.mxu0 %vm1138_vm0, %v1137_v0  ;;  %939 = vmatprep.subr.mxu1 %v1137_v0  ;;  %v877_v24 = vld [vmem:[%s1321_s4] ss:$0 sm:$0xff]  ;;  %v380_v57 = vld [vmem:[#allocation2 + $0x28] sm:$0xff] }
  0x2b   :  { %940 = vmatpush3.msra.mxu1 %v179_v11  ;;  %949 = vmatpush3.msra.mxu0 %v280_v32  ;;  %v277_v35 = vld [vmem:[#allocation5] sm:$0xff] }
  0x2c   :  { %941 = vmatprep.subr.mxu1 %v1137_v0  ;;  %950 = vmatprep.subr.mxu0 %v1137_v0  ;;  %v879_v46 = vld [vmem:[%s1323_s6] ss:$0 sm:$0xff] }
  0x2d   :  { %942 = vmatpush3.msra.mxu1 %v178_v12  ;;  %951 = vmatpush3.msra.mxu0 %v279_v33  ;;  %v379_v58 = vld [vmem:[#allocation2 + $0x20] sm:$0xff] }
  0x2e   :  { %943 = vmatprep.subr.mxu1 %v1137_v0  ;;  %952 = vmatprep.subr.mxu0 %v1137_v0 }
  0x2f   :  { %944 = vmatpush3.msra.mxu1 %v177_v13  ;;  %953 = vmatpush3.msra.mxu0 %v278_v34 }
  0x30   :  { %959 = vmatprep.subr.mxu1 %v1137_v0  ;;  %954 = vmatprep.subr.mxu0 %v1137_v0 }
  0x31   :  { %955 = vmatpush3.msra.mxu0 %v277_v35 }
  0x32   :  { %970 = vmatprep.subr.mxu0 %v1137_v0 }
  0xe9   :  { %v157_v4 = vpop.f32.mrf.mxu0 }
  0xea   :  { %v1217_v5 = vadd.f32 %v874_v3, %v157_v4 }
  0xeb   :  { %v936_v6 = vpop.f32.mrf.mxu0 }
  0xec   :  { %v162_v7 = vsel %vm161_vm3, %v1217_v5, 0.0  ;;  %v165_v8 = vmul.f32 %v1217_v5, %v1217_v5  ;;  %v882_v6 = vld [vmem:[%s1321_s4 + $0x1] ss:$0 sm:$0xff] }
  0xed   :  { %163 = vadd.xlane.f32.xlu0 %v162_v7 }
  0xee   :  { %v166_v9 = vsel %vm161_vm3, %v165_v8, 0.0 }
  0xf1   :  { %167 = vadd.xlane.f32.xlu0 %v166_v9 }
 0x176   :  { %v164_v14 = vpop.xlane.xlu0 %163 }
 0x177   :  { %v169_v15 = vmul.f32 0.03125, %v164_v14  ;;  %v484_v14 = vld [vmem:[#allocation5 + $0x38] sm:$0xff] }
 0x179   :  { %v171_v17 = vmul.f32 %v169_v15, %v169_v15  ;;  %v173_v21 = vsub.f32 %v1217_v5, %v169_v15  ;;  %v483_v15 = vld [vmem:[#allocation5 + $0x30] sm:$0xff] }
 0x17a   :  { %v168_v16 = vpop.xlane.xlu0 %167 }
 0x17b   :  { %v170_v18 = vmul.f32 0.03125, %v168_v16  ;;  %v482_v16 = vld [vmem:[#allocation5 + $0x28] sm:$0xff] }
 0x17d   :  { %v172_v19 = vsub.f32 %v170_v18, %v171_v17  ;;  %v481_v17 = vld [vmem:[#allocation5 + $0x20] sm:$0xff] }
 0x17f   :  { %v174_v20 = vadd.f32 1e-05, %v172_v19 }
 0x181   :  { %1022 = vrsqrt.f32 %v174_v20 }
 0x18e   :  { %v1023_v22 = vpop.eup %1022 }
 0x18f   :  { %v176_v23 = vmul.f32 %v1023_v22, %v173_v21 }
 0x191   :  { %946 = vmatmul.mubr.msk.f32.vlgmr.msra.gmra.mxu1 %vm161_vm3, %v176_v23 }
 0x192   :  { %967 = vmatprep.mubr.msk.f32.mxu1 %vm1138_vm0, %v1137_v0  ;;  %960 = vmatpush3.msra.mxu1 %v382_v55 }
 0x193   :  { %961 = vmatprep.subr.mxu1 %v1137_v0 }
 0x194   :  { %962 = vmatpush3.msra.mxu1 %v381_v56 }
 0x195   :  { %963 = vmatprep.subr.mxu1 %v1137_v0 }
 0x196   :  { %964 = vmatpush3.msra.mxu1 %v380_v57 }
 0x197   :  { %965 = vmatprep.subr.mxu1 %v1137_v0 }
 0x198   :  { %966 = vmatpush3.msra.mxu1 %v379_v58 }
 0x199   :  { %981 = vmatprep.subr.mxu1 %v1137_v0 }
 0x251   :  { %v257_v25 = vpop.f32.mrf.mxu1 }
 0x252   :  { %v258_v26 = vadd.f32 %v877_v24, %v257_v25 }
 0x253   :  { %v947_v27 = vpop.f32.mrf.mxu1 }
 0x254   :  { %1024 = vtanh.f32 %v258_v26 }
 0x261   :  { %v1025_v28 = vpop.eup %1024 }
 0x262   :  { %v262_v29 = vsel %vm161_vm3, %v1025_v28, 0.0  ;;  %v265_v30 = vmul.f32 %v1025_v28, %v1025_v28 }
 0x263   :  { %263 = vadd.xlane.f32.xlu1 %v262_v29 }
 0x264   :  { %v266_v31 = vsel %vm161_vm3, %v265_v30, 0.0 }
 0x267   :  { %267 = vadd.xlane.f32.xlu1 %v266_v31 }
 0x2ec   :  { %v264_v36 = vpop.xlane.xlu1 %263 }
 0x2ed   :  { %v269_v37 = vmul.f32 0.03125, %v264_v36 }
 0x2ef   :  { %v271_v39 = vmul.f32 %v269_v37, %v269_v37  ;;  %v273_v43 = vsub.f32 %v1025_v28, %v269_v37  ;;  %v885_v28 = vld [vmem:[%s1323_s6 + $0x1] ss:$0 sm:$0xff]  ;;  %v587_v37 = vld [vmem:[#allocation2 + $0x58] sm:$0xff] }
 0x2f0   :  { %v268_v38 = vpop.xlane.xlu1 %267 }
 0x2f1   :  { %v270_v40 = vmul.f32 0.03125, %v268_v38  ;;  %v586_v38 = vld [vmem:[#allocation2 + $0x50] sm:$0xff] }
 0x2f3   :  { %v272_v41 = vsub.f32 %v270_v40, %v271_v39  ;;  %v585_v39 = vld [vmem:[#allocation2 + $0x48] sm:$0xff]  ;;  %v584_v40 = vld [vmem:[#allocation2 + $0x40] sm:$0xff] }
 0x2f5   :  { %v274_v42 = vadd.f32 1e-05, %v272_v41 }
 0x2f7   :  { %1026 = vrsqrt.f32 %v274_v42 }
 0x304   :  { %v1027_v44 = vpop.eup %1026 }
 0x305   :  { %v276_v45 = vmul.f32 %v1027_v44, %v273_v43 }
 0x307   :  { %957 = vmatmul.mubr.msk.f32.vlgmr.msra.gmra.mxu0 %vm161_vm3, %v276_v45 }
 0x308   :  { %978 = vmatprep.mubr.msk.f32.mxu0 %vm1138_vm0, %v1137_v0  ;;  %971 = vmatpush3.msra.mxu0 %v484_v14  ;;  %v891_v14 = vld [vmem:[%s1323_s6 + $0x2] ss:$0 sm:$0xff]  ;;  %s1106_s6 = scalar_lea.vmem %s865_s19, 128 }
 0x309   :  { %972 = vmatprep.subr.mxu0 %v1137_v0  ;;  %p1107_p1 = scmp.ne.s32.totalorder %s865_s19, %s1106_s6  ;;  %p1112_p3 = scmp.lt.s32.totalorder %s1106_s6, %s1106_s6 }
 0x30a   :  { %973 = vmatpush3.msra.mxu0 %v483_v15 }
 0x30b   :  { %974 = vmatprep.subr.mxu0 %v1137_v0  ;;  %p1113_p4 = por %p1112_p3, %p1111_p2 }
 0x30c   :  { %975 = vmatpush3.msra.mxu0 %v482_v16 }
 0x30d   :  { %976 = vmatprep.subr.mxu0 %v1137_v0  ;;  %p1114_p5 = pnand %p1113_p4, %p1107_p1 }
 0x30e   :  { %977 = vmatpush3.msra.mxu0 %v481_v17 }
 0x30f   :  { %992 = vmatprep.subr.mxu0 %v1137_v0 }
 0x3c7   :  { %v357_v47 = vpop.f32.mrf.mxu0 }
 0x3c8   :  { %v358_v48 = vadd.f32 %v879_v46, %v357_v47 }
 0x3c9   :  { %v958_v49 = vpop.f32.mrf.mxu0 }
 0x3ca   :  { %v361_v50 = vadd.f32 %v358_v48, %v1217_v5 }
 0x3cc   :  { %1028 = vtanh.f32 %v361_v50 }
 0x3d9   :  { %v1248_v51 = vpop.eup %1028 }
 0x3da   :  { %v363_v52 = vsel %vm161_vm3, %v1248_v51, 0.0  ;;  %v366_v53 = vmul.f32 %v1248_v51, %v1248_v51 }
 0x3db   :  { %364 = vadd.xlane.f32.xlu0 %v363_v52 }
 0x3dc   :  { %v367_v54 = vsel %vm161_vm3, %v366_v53, 0.0 }
 0x3dd   :  { %368 = vadd.xlane.f32.xlu1 %v367_v54 }
 0x464   :  { %v365_v59 = vpop.xlane.xlu0 %364 }
 0x465   :  { %v370_v60 = vmul.f32 0.03125, %v365_v59  ;;  %v689_v59 = vld [vmem:[#allocation5 + $0x58] sm:$0xff] }
 0x466   :  { %v369_v61 = vpop.xlane.xlu1 %368 }
 0x467   :  { %v372_v62 = vmul.f32 %v370_v60, %v370_v60  ;;  %v371_v63 = vmul.f32 0.03125, %v369_v61  ;;  %v374_v3 = vsub.f32 %v1248_v51, %v370_v60  ;;  %v688_v60 = vld [vmem:[#allocation5 + $0x50] sm:$0xff]  ;;  %v687_v61 = vld [vmem:[#allocation5 + $0x48] sm:$0xff] }
 0x469   :  { %v373_v1 = vsub.f32 %v371_v63, %v372_v62  ;;  %v686_v62 = vld [vmem:[#allocation5 + $0x40] sm:$0xff] }
 0x46b   :  { %v375_v2 = vadd.f32 1e-05, %v373_v1 }
 0x46d   :  { %1030 = vrsqrt.f32 %v375_v2 }
 0x47a   :  { %v1031_v4 = vpop.eup %1030 }
 0x47b   :  { %v377_v5 = vmul.f32 %v1031_v4, %v374_v3 }
 0x47d   :  { %968 = vmatmul.mubr.msk.f32.vlgmr.msra.gmra.mxu1 %vm161_vm3, %v377_v5 }
 0x47e   :  { %989 = vmatprep.mubr.msk.f32.mxu1 %vm1138_vm0, %v1137_v0  ;;  %982 = vmatpush3.msra.mxu1 %v587_v37 }
 0x47f   :  { %983 = vmatprep.subr.mxu1 %v1137_v0 }
 0x480   :  { %984 = vmatpush3.msra.mxu1 %v586_v38 }
 0x481   :  { %985 = vmatprep.subr.mxu1 %v1137_v0 }
 0x482   :  { %986 = vmatpush3.msra.mxu1 %v585_v39 }
 0x483   :  { %987 = vmatprep.subr.mxu1 %v1137_v0 }
 0x484   :  { %988 = vmatpush3.msra.mxu1 %v584_v40 }
 0x485   :  { %1003 = vmatprep.subr.mxu1 %v1137_v0 }
 0x53d   :  { %v460_v7 = vpop.f32.mrf.mxu1 }
 0x53e   :  { %v461_v8 = vadd.f32 %v882_v6, %v460_v7 }
 0x53f   :  { %v969_v9 = vpop.f32.mrf.mxu1 }
 0x540   :  { %1032 = vtanh.f32 %v461_v8 }
 0x54d   :  { %v1033_v10 = vpop.eup %1032 }
 0x54e   :  { %v465_v11 = vsel %vm161_vm3, %v1033_v10, 0.0  ;;  %v468_v12 = vmul.f32 %v1033_v10, %v1033_v10 }
 0x54f   :  { %466 = vadd.xlane.f32.xlu0 %v465_v11  ;;  %v775_v11 = vld [vmem:[#allocation7 + $0x10] sm:$0xff] }
 0x550   :  { %v469_v13 = vsel %vm161_vm3, %v468_v12, 0.0  ;;  %v774_v12 = vld [vmem:[#allocation7 + $0x8] sm:$0xff] }
 0x551   :  { %470 = vadd.xlane.f32.xlu1 %v469_v13  ;;  %v773_v13 = vld [vmem:[#allocation7] sm:$0xff] }
 0x5d8   :  { %v467_v18 = vpop.xlane.xlu0 %466 }
 0x5d9   :  { %v472_v19 = vmul.f32 0.03125, %v467_v18 }
 0x5da   :  { %v471_v20 = vpop.xlane.xlu1 %470 }
 0x5db   :  { %v474_v21 = vmul.f32 %v472_v19, %v472_v19  ;;  %v473_v22 = vmul.f32 0.03125, %v471_v20  ;;  %v476_v25 = vsub.f32 %v1033_v10, %v472_v19  ;;  %v776_v10 = vld [vmem:[#allocation7 + $0x18] sm:$0xff]  ;;  %v893_v20 = vld [vmem:[%s1325_s8] ss:$0 sm:$0xff] }
 0x5dd   :  { %v475_v23 = vsub.f32 %v473_v22, %v474_v21 }
 0x5df   :  { %v477_v24 = vadd.f32 1e-05, %v475_v23 }
 0x5e1   :  { %1034 = vrsqrt.f32 %v477_v24 }
 0x5ee   :  { %v1035_v26 = vpop.eup %1034 }
 0x5ef   :  { %v479_v27 = vmul.f32 %v1035_v26, %v476_v25 }
 0x5f1   :  { %979 = vmatmul.mubr.msk.f32.vlgmr.msra.gmra.mxu0 %vm161_vm3, %v479_v27 }
 0x5f2   :  { %1000 = vmatprep.mubr.msk.f32.mxu0 %vm1138_vm0, %v1137_v0  ;;  %993 = vmatpush3.msra.mxu0 %v689_v59 }
 0x5f3   :  { %994 = vmatprep.subr.mxu0 %v1137_v0 }
 0x5f4   :  { %995 = vmatpush3.msra.mxu0 %v688_v60 }
 0x5f5   :  { %996 = vmatprep.subr.mxu0 %v1137_v0 }
 0x5f6   :  { %997 = vmatpush3.msra.mxu0 %v687_v61 }
 0x5f7   :  { %998 = vmatprep.subr.mxu0 %v1137_v0 }
 0x5f8   :  { %999 = vmatpush3.msra.mxu0 %v686_v62 }
 0x6b1   :  { %v562_v29 = vpop.f32.mrf.mxu0 }
 0x6b2   :  { %v563_v30 = vadd.f32 %v885_v28, %v562_v29 }
 0x6b3   :  { %v980_v31 = vpop.f32.mrf.mxu0 }
 0x6b4   :  { %v566_v32 = vadd.f32 %v1248_v51, %v563_v30  ;;  %v888_v51 = vld [vmem:[%s1321_s4 + $0x2] ss:$0 sm:$0xff] }
 0x6b6   :  { %1036 = vtanh.f32 %v566_v32 }
 0x6c3   :  { %v1279_v33 = vpop.eup %1036 }
 0x6c4   :  { %v568_v34 = vsel %vm161_vm3, %v1279_v33, 0.0  ;;  %v571_v35 = vmul.f32 %v1279_v33, %v1279_v33 }
 0x6c5   :  { %569 = vadd.xlane.f32.xlu0 %v568_v34 }
 0x6c6   :  { %v572_v36 = vsel %vm161_vm3, %v571_v35, 0.0 }
 0x6c7   :  { %573 = vadd.xlane.f32.xlu1 %v572_v36 }
 0x74e   :  { %v570_v41 = vpop.xlane.xlu0 %569 }
 0x74f   :  { %v575_v42 = vmul.f32 0.03125, %v570_v41 }
 0x750   :  { %v574_v43 = vpop.xlane.xlu1 %573 }
 0x751   :  { %v577_v44 = vmul.f32 %v575_v42, %v575_v42  ;;  %v576_v45 = vmul.f32 0.03125, %v574_v43  ;;  %v579_v48 = vsub.f32 %v1279_v33, %v575_v42 }
 0x753   :  { %v578_v46 = vsub.f32 %v576_v45, %v577_v44 }
 0x755   :  { %v580_v47 = vadd.f32 1e-05, %v578_v46 }
 0x757   :  { %1038 = vrsqrt.f32 %v580_v47 }
 0x764   :  { %v1039_v49 = vpop.eup %1038 }
 0x765   :  { %v582_v50 = vmul.f32 %v1039_v49, %v579_v48 }
 0x767   :  { %990 = vmatmul.mubr.msk.f32.vlgmr.msra.gmra.mxu1 %vm161_vm3, %v582_v50 }
 0x768   :  { %1011 = vmatprep.mubr.msk.f32.mxu1 %vm1138_vm0, %v1137_v0  ;;  %1004 = vmatpush3.msra.mxu1 %v776_v10 }
 0x769   :  { %1005 = vmatprep.subr.mxu1 %v1137_v0 }
 0x76a   :  { %1006 = vmatpush3.msra.mxu1 %v775_v11 }
 0x76b   :  { %1007 = vmatprep.subr.mxu1 %v1137_v0 }
 0x76c   :  { %1008 = vmatpush3.msra.mxu1 %v774_v12 }
 0x76d   :  { %1009 = vmatprep.subr.mxu1 %v1137_v0 }
 0x76e   :  { %1010 = vmatpush3.msra.mxu1 %v773_v13 }
 0x827   :  { %v665_v52 = vpop.f32.mrf.mxu1 }
 0x828   :  { %v666_v53 = vadd.f32 %v888_v51, %v665_v52 }
 0x829   :  { %v991_v54 = vpop.f32.mrf.mxu1 }
 0x82a   :  { %1040 = vtanh.f32 %v666_v53 }
 0x837   :  { %v1041_v55 = vpop.eup %1040 }
 0x838   :  { %v670_v56 = vsel %vm161_vm3, %v1041_v55, 0.0  ;;  %v673_v57 = vmul.f32 %v1041_v55, %v1041_v55 }
 0x839   :  { %671 = vadd.xlane.f32.xlu0 %v670_v56 }
 0x83a   :  { %v674_v58 = vsel %vm161_vm3, %v673_v57, 0.0 }
 0x83b   :  { %675 = vadd.xlane.f32.xlu1 %v674_v58 }
 0x8c2   :  { %v672_v63 = vpop.xlane.xlu0 %671 }
 0x8c3   :  { %v677_v1 = vmul.f32 0.03125, %v672_v63 }
 0x8c4   :  { %v676_v2 = vpop.xlane.xlu1 %675 }
 0x8c5   :  { %v679_v3 = vmul.f32 %v677_v1, %v677_v1  ;;  %v678_v4 = vmul.f32 0.03125, %v676_v2  ;;  %v681_v7 = vsub.f32 %v1041_v55, %v677_v1 }
 0x8c7   :  { %v680_v5 = vsub.f32 %v678_v4, %v679_v3 }
 0x8c9   :  { %v682_v6 = vadd.f32 1e-05, %v680_v5 }
 0x8cb   :  { %1042 = vrsqrt.f32 %v682_v6 }
 0x8d8   :  { %v1043_v8 = vpop.eup %1042 }
 0x8d9   :  { %v684_v9 = vmul.f32 %v1043_v8, %v681_v7 }
 0x8db   :  { %1001 = vmatmul.mubr.msk.f32.vlgmr.msra.gmra.mxu0 %vm161_vm3, %v684_v9 }
 0x99b   :  { %v767_v15 = vpop.f32.mrf.mxu0 }
 0x99c   :  { %v768_v16 = vadd.f32 %v891_v14, %v767_v15 }
 0x99d   :  { %v1002_v17 = vpop.f32.mrf.mxu0 }
 0x99e   :  { %v771_v18 = vadd.f32 %v1279_v33, %v768_v16 }
 0x9a0   :  { %1044 = vtanh.f32 %v771_v18 }
 0x9ad   :  { %v1045_v19 = vpop.eup %1044 }
 0x9ae   :  { %1012 = vmatmul.mubr.msk.f32.vlgmr.msra.gmra.mxu1 %vm161_vm3, %v1045_v19 }
 0xa6e   :  { %v853_v0 = vpop.f32.mrf.mxu1 }
 0xa6f   :  { %v854_v21 = vadd.f32 %v893_v20, %v853_v0 }
 0xa70   :  { %v1013_v22 = vpop.f32.mrf.mxu1 }
 0xa71   :  { %857 = vst [vmem:[#allocation8] sm:$0xff] %v854_v21 }
 0xa72   :  { %1117 = shalt.err (!%p1114_p5)
}
 0xa73   :  { %867 = dma.vmem_to_hbm [thread:$0]  %s865_s19, 128, %s1326_s9, [#allocation4]  }
 0xa74   :  { %1130 = dma.done.wait [#allocation4], 128  }
 0xa75   :  { %1131 = vsyncadd [#allocation4], 4294967168 }
 0xa76   :  { %871 = vsyncpa [#allocation3], 1 }
 0xa77   :  { %872 = vsyncpa [#allocation6], 1 }
 0xa78   :  { %873 = vsyncpa [#allocation4], 1 }

</bundles_post_ra>
